<compile_context>
chip_gen: v7x
topology: tpu7x:2x2x1
jax: 0.10.0
libtpu: 0.0.40
codegen_flags: <defaults>
</compile_context>

<pallas_src>
import functools

import jax
import jax.numpy as jnp
import numpy as np
from jax.experimental import pallas as pl
from jax.experimental.pallas import tpu as pltpu

LANE = 128  # TPU vreg lane width


def _round_up(n, m):
    return ((n + m - 1) // m) * m


def actor_kernel(x_ref, w1_ref, b1_ref, w2_ref, b2_ref, w3_ref, b3_ref, o_ref):
    x = x_ref[...]                                            # [3, Bt]  (batch on lanes)

    # Layer 1 (3 -> 128) on the MXU (K=3 is padded by the hardware); bias+ReLU on VPU.
    h1 = jnp.dot(w1_ref[...], x,
                 preferred_element_type=jnp.float32) + b1_ref[...]   # [128, Bt]
    h1 = jnp.maximum(h1, 0.0)

    # Layer 2 (128 -> 64) on the MXU, N = Bt.
    h2 = jnp.dot(w2_ref[...], h1,
                 preferred_element_type=jnp.float32) + b2_ref[...]   # [64, Bt]
    h2 = jnp.maximum(h2, 0.0)

    # Layer 3 (64 -> 1): [1,64] @ [64,Bt] -> [1,Bt] (lane-dense output).
    out = jnp.dot(w3_ref[...], h2,
                  preferred_element_type=jnp.float32) + b3_ref[...]  # [1, Bt]

    o_ref[...] = jnp.clip(out, -2.0, 2.0)


@functools.partial(jax.jit, static_argnames=("bt_max",))
def actor_forward(state, params, *, bt_max=16384):
    """state: [B, 3] f32; params feature-major (W: [out, in], b: [out, 1]).

    Returns [B, 1] f32, identical semantics to the PyTorch Actor.forward.
    """
    w1, b1, w2, b2, w3, b3 = params
    B = state.shape[0]

    # --- Batch tile selection -------------------------------------------------
    # Small batch   : one lane-aligned tile.
    # Mid-size batch: exactly 2 tiles (lets the "parallel" grid axis shard
    #                 across both v7x TensorCores; free on v5e/v6e).
    # Large batch   : stream bt_max-sized tiles (per-step overhead amortized).
    b_lane = _round_up(max(B, 1), LANE)
    if b_lane <= LANE:
        bt = LANE
    elif b_lane <= 2 * bt_max:
        bt = _round_up((b_lane + 1) // 2, LANE)
    else:
        bt = bt_max
    b_pad = _round_up(B, bt)
    grid = (b_pad // bt,)

    # Fused relayout: pad the batch dim, then transpose to feature-major [3, B_pad]
    # in a single expression (padded columns are zeros; nothing reduces over batch).
    x = jnp.pad(state.astype(jnp.float32), ((0, b_pad - B), (0, 0))).T   # [3, b_pad]

    def resident(shape):
        # Weights/biases: same block every grid step -> fetched once, VMEM-resident.
        return pl.BlockSpec(shape, lambda i: (0, 0))

    n_weight_bytes = 4 * (128 * 3 + 128 + 64 * 128 + 64 + 1 * 64 + 1)
    cost = pl.CostEstimate(
        flops=2 * b_pad * (3 * 128 + 128 * 64 + 64 * 1),
        transcendentals=0,
        bytes_accessed=4 * b_pad * (3 + 1) + n_weight_bytes,
    )

    out = pl.pallas_call(
        actor_kernel,
        out_shape=jax.ShapeDtypeStruct((1, b_pad), jnp.float32),
        grid=grid,
        in_specs=[
            pl.BlockSpec((3, bt), lambda i: (0, i)),        # streamed activations
            resident((128, 3)), resident((128, 1)),         # W1, b1
            resident((64, 128)), resident((64, 1)),         # W2, b2
            resident((1, 64)), resident((1, 1)),            # W3, b3
        ],
        out_specs=pl.BlockSpec((1, bt), lambda i: (0, i)),
        compiler_params=pltpu.CompilerParams(
            dimension_semantics=("parallel",),
            vmem_limit_bytes=48 << 20,                      # covers big tiles on v5e's 16 MiB scoped default
        ),
        cost_estimate=cost,
    )(x, w1, b1, w2, b2, w3, b3)

    return out[:, :B].T                                     # [B, 1]


def init_params(key):
    """PyTorch nn.Linear-style init: U(-1/sqrt(fan_in), 1/sqrt(fan_in)).

    Stored feature-major: W is [out, in] (same as torch), b is [out, 1].
    """
    dims = [(3, 128), (128, 64), (64, 1)]
    params = []
    for fan_in, fan_out in dims:
        kw, kb, key = jax.random.split(key, 3)
        bound = 1.0 / np.sqrt(fan_in)
        w = jax.random.uniform(kw, (fan_out, fan_in), jnp.float32, -bound, bound)
        b = jax.random.uniform(kb, (fan_out, 1), jnp.float32, -bound, bound)
        params += [w, b]
    return tuple(params)


def actor_ref(state, params):
    """Pure-JAX reference (high-precision matmuls) of the PyTorch forward."""
    w1, b1, w2, b2, w3, b3 = params
    hp = jax.lax.Precision.HIGHEST
    h1 = jnp.maximum(jnp.dot(state, w1.T, precision=hp) + b1.T, 0.0)
    h2 = jnp.maximum(jnp.dot(h1, w2.T, precision=hp) + b2.T, 0.0)
    return jnp.clip(jnp.dot(h2, w3.T, precision=hp) + b3.T, -2.0, 2.0)


if __name__ == "__main__":
    key = jax.random.PRNGKey(0)
    kx, kp, kx2, kx3 = jax.random.split(key, 4)
    params = init_params(kp)

    # Small batch (typical DDPG inference): single lane-aligned tile.
    B = 8
    state = jax.random.normal(kx, (B, 3), jnp.float32)
    out = jax.block_until_ready(actor_forward(state, params))
    np.testing.assert_allclose(np.asarray(out), np.asarray(actor_ref(state, params)),
                               rtol=1e-4, atol=1e-4)
    assert out.shape == (B, 1)

    # Mid-size batch: exactly 2 grid steps (v7x megacore path) + tail padding.
    B2 = 3000
    state2 = jax.random.normal(kx2, (B2, 3), jnp.float32)
    out2 = jax.block_until_ready(actor_forward(state2, params))
    np.testing.assert_allclose(np.asarray(out2), np.asarray(actor_ref(state2, params)),
                               rtol=1e-4, atol=1e-4)
    assert out2.shape == (B2, 1)

    # Large batch: streamed 16K tiles (exercises the pipelined multi-tile grid).
    B3 = 40000
    state3 = jax.random.normal(kx3, (B3, 3), jnp.float32)
    out3 = jax.block_until_ready(actor_forward(state3, params))
    np.testing.assert_allclose(np.asarray(out3), np.asarray(actor_ref(state3, params)),
                               rtol=1e-4, atol=1e-4)
    assert out3.shape == (B3, 1)

    print("KERNEL_OK")
</pallas_src>

<mosaic_0001>
module attributes {stable_mosaic.version = 11 : i64} {
  func.func @actor_kernel(%arg0: i32, %arg1: memref<3x128xf32, #tpu.memory_space<vmem>>, %arg2: memref<128x3xf32, #tpu.memory_space<vmem>>, %arg3: memref<128x1xf32, #tpu.memory_space<vmem>>, %arg4: memref<64x128xf32, #tpu.memory_space<vmem>>, %arg5: memref<64x1xf32, #tpu.memory_space<vmem>>, %arg6: memref<1x64xf32, #tpu.memory_space<vmem>>, %arg7: memref<1x1xf32, #tpu.memory_space<vmem>>, %arg8: memref<1x128xf32, #tpu.memory_space<vmem>>) attributes {dimension_semantics = [#tpu.dimension_semantics<parallel>], iteration_bounds = array<i64: 1>, scalar_prefetch = 0 : i64, scratch_operands = 0 : i64, tpu.core_type = #tpu.core_type<tc>, window_params = [{transform_indices = @transform_0, window_bounds = array<i64: 3, 128>}, {pipeline_mode = #tpu.pipeline_mode<synchronous>, transform_indices = @transform_1, window_bounds = array<i64: 128, 3>}, {pipeline_mode = #tpu.pipeline_mode<synchronous>, transform_indices = @transform_2, window_bounds = array<i64: 128, 1>}, {pipeline_mode = #tpu.pipeline_mode<synchronous>, transform_indices = @transform_3, window_bounds = array<i64: 64, 128>}, {pipeline_mode = #tpu.pipeline_mode<synchronous>, transform_indices = @transform_4, window_bounds = array<i64: 64, 1>}, {pipeline_mode = #tpu.pipeline_mode<synchronous>, transform_indices = @transform_5, window_bounds = array<i64: 1, 64>}, {pipeline_mode = #tpu.pipeline_mode<synchronous>, transform_indices = @transform_6, window_bounds = array<i64: 1, 1>}, {transform_indices = @transform_7, window_bounds = array<i64: 1, 128>}]} {
    %c0 = arith.constant 0 : index
    %c0_0 = arith.constant 0 : index
    %0 = vector.load %arg1[%c0, %c0_0] : memref<3x128xf32, #tpu.memory_space<vmem>>, vector<3x128xf32>
    %c0_1 = arith.constant 0 : index
    %c0_2 = arith.constant 0 : index
    %1 = vector.load %arg2[%c0_1, %c0_2] : memref<128x3xf32, #tpu.memory_space<vmem>>, vector<128x3xf32>
    %cst = arith.constant dense<0.000000e+00> : vector<128x128xf32>
    %2 = tpu.matmul %1, %0, %cst {dimension_numbers = #tpu.dot_dimension_numbers<[1], [0], [0], [1], [0, 0, 1, 1], [], []>} : vector<128x3xf32>, vector<3x128xf32>, vector<128x128xf32> -> vector<128x128xf32>
    %c0_3 = arith.constant 0 : index
    %c0_4 = arith.constant 0 : index
    %3 = vector.load %arg3[%c0_3, %c0_4] : memref<128x1xf32, #tpu.memory_space<vmem>>, vector<128x1xf32>
    %4 = vector.broadcast %3 : vector<128x1xf32> to vector<128x128xf32>
    %5 = arith.addf %2, %4 : vector<128x128xf32>
    %cst_5 = arith.constant 0.000000e+00 : f32
    %6 = vector.broadcast %cst_5 : f32 to vector<128x128xf32>
    %7 = arith.maximumf %5, %6 : vector<128x128xf32>
    %c0_6 = arith.constant 0 : index
    %c0_7 = arith.constant 0 : index
    %8 = vector.load %arg4[%c0_6, %c0_7] : memref<64x128xf32, #tpu.memory_space<vmem>>, vector<64x128xf32>
    %cst_8 = arith.constant dense<0.000000e+00> : vector<64x128xf32>
    %9 = tpu.matmul %8, %7, %cst_8 {dimension_numbers = #tpu.dot_dimension_numbers<[1], [0], [0], [1], [0, 0, 1, 1], [], []>} : vector<64x128xf32>, vector<128x128xf32>, vector<64x128xf32> -> vector<64x128xf32>
    %c0_9 = arith.constant 0 : index
    %c0_10 = arith.constant 0 : index
    %10 = vector.load %arg5[%c0_9, %c0_10] : memref<64x1xf32, #tpu.memory_space<vmem>>, vector<64x1xf32>
    %11 = vector.broadcast %10 : vector<64x1xf32> to vector<64x128xf32>
    %12 = arith.addf %9, %11 : vector<64x128xf32>
    %cst_11 = arith.constant 0.000000e+00 : f32
    %13 = vector.broadcast %cst_11 : f32 to vector<64x128xf32>
    %14 = arith.maximumf %12, %13 : vector<64x128xf32>
    %c0_12 = arith.constant 0 : index
    %c0_13 = arith.constant 0 : index
    %15 = vector.load %arg6[%c0_12, %c0_13] : memref<1x64xf32, #tpu.memory_space<vmem>>, vector<1x64xf32>
    %cst_14 = arith.constant dense<0.000000e+00> : vector<1x128xf32>
    %16 = tpu.matmul %15, %14, %cst_14 {dimension_numbers = #tpu.dot_dimension_numbers<[1], [0], [0], [1], [0, 0, 1, 1], [], []>} : vector<1x64xf32>, vector<64x128xf32>, vector<1x128xf32> -> vector<1x128xf32>
    %c0_15 = arith.constant 0 : index
    %c0_16 = arith.constant 0 : index
    %17 = vector.load %arg7[%c0_15, %c0_16] : memref<1x1xf32, #tpu.memory_space<vmem>>, vector<1x1xf32>
    %18 = vector.broadcast %17 : vector<1x1xf32> to vector<1x128xf32>
    %19 = arith.addf %16, %18 : vector<1x128xf32>
    %cst_17 = arith.constant -2.000000e+00 : f32
    %cst_18 = arith.constant 2.000000e+00 : f32
    %20 = vector.broadcast %cst_17 : f32 to vector<1x128xf32>
    %21 = arith.maximumf %20, %19 : vector<1x128xf32>
    %22 = vector.broadcast %cst_18 : f32 to vector<1x128xf32>
    %23 = arith.minimumf %22, %21 : vector<1x128xf32>
    %c0_19 = arith.constant 0 : index
    %c0_20 = arith.constant 0 : index
    %24 = vector.load %arg8[%c0_19, %c0_20] : memref<1x128xf32, #tpu.memory_space<vmem>>, vector<1x128xf32>
    tpu.vector_store %arg8[%c0_19, %c0_20], %23 {strides = array<i32>} : memref<1x128xf32, #tpu.memory_space<vmem>>, vector<1x128xf32>,
    return
  }
  func.func @transform_0(%arg0: i32) -> (i32, i32) {
    %c0_i32 = arith.constant 0 : i32
    %c0_i32_0 = arith.constant 0 : i32
    return %c0_i32, %arg0 : i32, i32
  }
  func.func @transform_1(%arg0: i32) -> (i32, i32) {
    %c0_i32 = arith.constant 0 : i32
    %c0_i32_0 = arith.constant 0 : i32
    %c0_i32_1 = arith.constant 0 : i32
    return %c0_i32, %c0_i32_0 : i32, i32
  }
  func.func @transform_2(%arg0: i32) -> (i32, i32) {
    %c0_i32 = arith.constant 0 : i32
    %c0_i32_0 = arith.constant 0 : i32
    %c0_i32_1 = arith.constant 0 : i32
    return %c0_i32, %c0_i32_0 : i32, i32
  }
  func.func @transform_3(%arg0: i32) -> (i32, i32) {
    %c0_i32 = arith.constant 0 : i32
    %c0_i32_0 = arith.constant 0 : i32
    %c0_i32_1 = arith.constant 0 : i32
    return %c0_i32, %c0_i32_0 : i32, i32
  }
  func.func @transform_4(%arg0: i32) -> (i32, i32) {
    %c0_i32 = arith.constant 0 : i32
    %c0_i32_0 = arith.constant 0 : i32
    %c0_i32_1 = arith.constant 0 : i32
    return %c0_i32, %c0_i32_0 : i32, i32
  }
  func.func @transform_5(%arg0: i32) -> (i32, i32) {
    %c0_i32 = arith.constant 0 : i32
    %c0_i32_0 = arith.constant 0 : i32
    %c0_i32_1 = arith.constant 0 : i32
    return %c0_i32, %c0_i32_0 : i32, i32
  }
  func.func @transform_6(%arg0: i32) -> (i32, i32) {
    %c0_i32 = arith.constant 0 : i32
    %c0_i32_0 = arith.constant 0 : i32
    %c0_i32_1 = arith.constant 0 : i32
    return %c0_i32, %c0_i32_0 : i32, i32
  }
  func.func @transform_7(%arg0: i32) -> (i32, i32) {
    %c0_i32 = arith.constant 0 : i32
    %c0_i32_0 = arith.constant 0 : i32
    return %c0_i32, %arg0 : i32, i32
  }
}

</mosaic_0001>

<bundles_post_ra>
// kernel: actor_forward.1
= control target key start
LH: loop header
LB: loop body
LE: loop exit
PB: predicated region body
PF: predicated region fallthrough
CT: control target
= control target key end

     0   :  { %vm190_vm0 = vcmask 1042432   ;;  %vm141_vm1 = vcmask 23552   ;;  %v824_v3 = vmov 0   ;;  %vm826_vm2 = vmmov 0   ;;  %s1040_s0 = inlined_call_operand.vmem [shape: f32[3,128], index: 0, kind: input, shape index: {}]   ;;  %s1041_s1 = inlined_call_operand.vmem [shape: f32[128,3], index: 1, kind: input, shape index: {}]   ;;  %s1042_s6 = inlined_call_operand.<no memory space> [shape: f32[1,1], index: 6, kind: input, shape index: {}]   ;;  %s1043_s2 = inlined_call_operand.vmem [shape: f32[128,1], index: 2, kind: input, shape index: {}]   ;;  %s1044_s4 = inlined_call_operand.vmem [shape: f32[64,1], index: 4, kind: input, shape index: {}]   ;;  %s1045_s3 = inlined_call_operand.vmem [shape: f32[64,128], index: 3, kind: input, shape index: {}]   ;;  %s1046_s5 = inlined_call_operand.vmem [shape: f32[1,64], index: 5, kind: input, shape index: {}]   ;;  %s1047_s7 = inlined_call_operand.vmem [shape: f32[1,128], index: 7, kind: output, shape index: {}]  }
   0x1   :  { %v28_v0 = vld [vmem:[%s1040_s0] sm:$0x7]  ;;  %v30_v2 = vld [vmem:[%s1041_s1 + $0x8] sm:$0xff]  ;;  %822 = vset.pattern.permute.xlu0 %v824_v3  ;;  %823 = vset.pattern.permute.xlu1 %v824_v3  ;;  %v12_v4 = vstv %s1042_s6  ;;  %v31_v5 = vld [vmem:[%s1041_s1 + $0x10] sm:$0xff]  ;;  %vm535_vm3 = vcmask 523264  }
   0x2   :  { %v29_v1 = vld [vmem:[%s1041_s1] sm:$0xff]  ;;  %685 = vmatprep.subr.msk.mxu0 %vm190_vm0, %v28_v0  ;;  %13 = vst [vmem:[#allocation2] sm:$0x1] %v12_v4  ;;  %v32_v6 = vld [vmem:[%s1041_s1 + $0x18] sm:$0xff]  ;;  %v47_v9 = vld [vmem:[%s1043_s2 + $0x10] sm:$0xff] }
   0x3   :  { %687 = vmatprep.mubr.msk.f32.mxu0 %vm141_vm1, %v29_v1  ;;  %686 = vmatpush3.msk.msra.mxu0 %vm190_vm0, %v28_v0  ;;  %v33_v7 = vld [vmem:[%s1041_s1 + $0x20] sm:$0xff]  ;;  %v46_v10 = vld [vmem:[%s1043_s2 + $0x8] sm:$0xff]  ;;  %v48_v12 = vld [vmem:[%s1043_s2 + $0x18] sm:$0xff] }
   0x4   :  { %688 = vmatmul.mubr.msk.f32.vlgmr.msra.gmra.mrb[0].mxu0 %vm141_vm1, %v30_v2  ;;  %v45_v8 = vld [vmem:[%s1043_s2] sm:$0xff]  ;;  %73 = vperm.xlu1 %823, %v47_v9   ;;  %v34_v11 = vld [vmem:[%s1041_s1 + $0x28] sm:$0xff]  ;;  %v35_v13 = vld [vmem:[%s1041_s1 + $0x30] sm:$0xff] }
   0x5   :  { %690 = vmatprep.mubr.msk.f32.mxu0 %vm141_vm1, %v31_v5  ;;  %63 = vperm.xlu0 %822, %v45_v8   ;;  %v49_v14 = vld [vmem:[%s1043_s2 + $0x20] sm:$0xff]  ;;  %v36_v15 = vld [vmem:[%s1041_s1 + $0x38] sm:$0xff]  ;;  %v50_v16 = vld [vmem:[%s1043_s2 + $0x28] sm:$0xff] }
   0x6   :  { %v37_v17 = vld [vmem:[%s1041_s1 + $0x40] sm:$0xff]  ;;  %v51_v18 = vld [vmem:[%s1043_s2 + $0x30] sm:$0xff]  ;;  %v38_v19 = vld [vmem:[%s1041_s1 + $0x48] sm:$0xff] }
   0x7   :  { %v52_v20 = vld [vmem:[%s1043_s2 + $0x38] sm:$0xff]  ;;  %v39_v21 = vld [vmem:[%s1041_s1 + $0x50] sm:$0xff]  ;;  %v53_v22 = vld [vmem:[%s1043_s2 + $0x40] sm:$0xff] }
   0x8   :  { %691 = vmatmul.mubr.msk.f32.gmra.mrb[2].mxu0 %vm141_vm1, %v32_v6  ;;  %78 = vperm.xlu1 %823, %v48_v12   ;;  %v40_v23 = vld [vmem:[%s1041_s1 + $0x58] sm:$0xff]  ;;  %v54_v24 = vld [vmem:[%s1043_s2 + $0x48] sm:$0xff]  ;;  %v41_v25 = vld [vmem:[%s1041_s1 + $0x60] sm:$0xff] }
   0x9   :  { %693 = vmatprep.mubr.msk.f32.mxu0 %vm141_vm1, %v33_v7  ;;  %68 = vperm.xlu0 %822, %v46_v10   ;;  %v55_v26 = vld [vmem:[%s1043_s2 + $0x50] sm:$0xff]  ;;  %v42_v27 = vld [vmem:[%s1041_s1 + $0x68] sm:$0xff]  ;;  %v56_v28 = vld [vmem:[%s1043_s2 + $0x58] sm:$0xff] }
   0xa   :  { %v43_v29 = vld [vmem:[%s1041_s1 + $0x70] sm:$0xff]  ;;  %v57_v30 = vld [vmem:[%s1043_s2 + $0x60] sm:$0xff]  ;;  %v44_v31 = vld [vmem:[%s1041_s1 + $0x78] sm:$0xff] }
   0xb   :  { %v58_v32 = vld [vmem:[%s1043_s2 + $0x68] sm:$0xff]  ;;  %v59_v33 = vld [vmem:[%s1043_s2 + $0x70] sm:$0xff]  ;;  %v60_v34 = vld [vmem:[%s1043_s2 + $0x78] sm:$0xff] }
   0xc   :  { %694 = vmatmul.mubr.msk.f32.gmra.mrb[4].mxu0 %vm141_vm1, %v34_v11  ;;  %88 = vperm.xlu1 %823, %v50_v16   ;;  %v363_v35 = vld [vmem:[%s1044_s4] sm:$0xff]  ;;  %v364_v36 = vld [vmem:[%s1044_s4 + $0x8] sm:$0xff]  ;;  %v365_v37 = vld [vmem:[%s1044_s4 + $0x10] sm:$0xff] }
   0xd   :  { %696 = vmatprep.mubr.msk.f32.mxu0 %vm141_vm1, %v35_v13  ;;  %83 = vperm.xlu0 %822, %v49_v14   ;;  %v366_v38 = vld [vmem:[%s1044_s4 + $0x18] sm:$0xff]  ;;  %v367_v39 = vld [vmem:[%s1044_s4 + $0x20] sm:$0xff]  ;;  %v368_v40 = vld [vmem:[%s1044_s4 + $0x28] sm:$0xff] }
   0xe   :  { %v369_v41 = vld [vmem:[%s1044_s4 + $0x30] sm:$0xff]  ;;  %v370_v42 = vld [vmem:[%s1044_s4 + $0x38] sm:$0xff]  ;;  %v525_v43 = vld [vmem:[#allocation2] sm:$0x1] }
   0xf   :  { %v355_v44 = vld [vmem:[%s1045_s3] sm:$0xff] }
  0x10   :  { %697 = vmatmul.mubr.msk.f32.gmra.mrb[6].mxu0 %vm141_vm1, %v36_v15  ;;  %98 = vperm.xlu1 %823, %v52_v20  }
  0x11   :  { %699 = vmatprep.mubr.msk.f32.mxu0 %vm141_vm1, %v37_v17  ;;  %93 = vperm.xlu0 %822, %v51_v18  }
  0x12   :  { %743 = vmatprep.mubr.f32.mxu1 %v355_v44 }
  0x14   :  { %700 = vmatmul.mubr.msk.f32.gmra.mrb[8].mxu0 %vm141_vm1, %v38_v19  ;;  %108 = vperm.xlu1 %823, %v54_v24  }
  0x15   :  { %702 = vmatprep.mubr.msk.f32.mxu0 %vm141_vm1, %v39_v21  ;;  %103 = vperm.xlu0 %822, %v53_v22  }
  0x18   :  { %703 = vmatmul.mubr.msk.f32.gmra.mrb[10].mxu0 %vm141_vm1, %v40_v23  ;;  %118 = vperm.xlu1 %823, %v56_v28  }
  0x19   :  { %705 = vmatprep.mubr.msk.f32.mxu0 %vm141_vm1, %v41_v25  ;;  %113 = vperm.xlu0 %822, %v55_v26  }
  0x1c   :  { %706 = vmatmul.mubr.msk.f32.gmra.mrb[12].mxu0 %vm141_vm1, %v42_v27  ;;  %128 = vperm.xlu1 %823, %v58_v32  }
  0x1d   :  { %708 = vmatprep.mubr.msk.f32.mxu0 %vm141_vm1, %v43_v29  ;;  %123 = vperm.xlu0 %822, %v57_v30  }
  0x20   :  { %709 = vmatmul.mubr.msk.f32.gmra.mrb[14].mxu0 %vm141_vm1, %v44_v31  ;;  %138 = vperm.xlu1 %823, %v60_v34  }
  0x21   :  { %133 = vperm.xlu0 %822, %v59_v33  }
  0x24   :  { %378 = vperm.xlu1 %823, %v364_v36  }
  0x25   :  { %373 = vperm.xlu0 %822, %v363_v35  }
  0x28   :  { %388 = vperm.xlu1 %823, %v366_v38  }
  0x29   :  { %383 = vperm.xlu0 %822, %v365_v37  }
  0x2c   :  { %398 = vperm.xlu1 %823, %v368_v40  }
  0x2d   :  { %393 = vperm.xlu0 %822, %v367_v39  }
  0x30   :  { %408 = vperm.xlu1 %823, %v370_v42  }
  0x31   :  { %403 = vperm.xlu0 %822, %v369_v41  }
  0x35   :  { %528 = vperm.xlu0 %822, %v525_v43  }
  0x83   :  { %v74_v45 = vpop.permute.xlu1 %73 }
  0x84   :  { %v64_v46 = vpop.permute.xlu0 %63 }
  0x87   :  { %v79_v47 = vpop.permute.xlu1 %78 }
  0x88   :  { %v69_v48 = vpop.permute.xlu0 %68 }
  0x8b   :  { %v89_v49 = vpop.permute.xlu1 %88 }
  0x8c   :  { %v84_v50 = vpop.permute.xlu0 %83 }
  0x8f   :  { %v99_v56 = vpop.permute.xlu1 %98 }
  0x90   :  { %v94_v59 = vpop.permute.xlu0 %93 }
  0x93   :  { %v109_v5 = vpop.permute.xlu1 %108 }
  0x94   :  { %v104_v8 = vpop.permute.xlu0 %103 }
  0x97   :  { %v119_v17 = vpop.permute.xlu1 %118 }
  0x98   :  { %v114_v20 = vpop.permute.xlu0 %113 }
  0x9b   :  { %v129_v30 = vpop.permute.xlu1 %128 }
  0x9c   :  { %v124_v33 = vpop.permute.xlu0 %123 }
  0x9f   :  { %v139_v42 = vpop.permute.xlu1 %138 }
  0xd7   :  { %v689_v51 = vpop.f32.mrb[0].mxu0 }
  0xd8   :  { %v266_v52 = vadd.f32 %v689_v51, %v69_v48  ;;  %v260_v53 = vpop.f32.mrb[1].mxu0 }
  0xd9   :  { %v261_v54 = vadd.f32 %v260_v53, %v64_v46  ;;  %v356_v53 = vld [vmem:[%s1045_s3 + $0x8] sm:$0xff] }
  0xda   :  { %v340_v55 = vmax.f32 %v266_v52, 0.0 }
  0xdb   :  { %v339_v57 = vmax.f32 %v261_v54, 0.0  ;;  %v692_v58 = vpop.f32.mrb[2].mxu0  ;;  %v357_v54 = vld [vmem:[%s1045_s3 + $0x10] sm:$0xff] }
  0xdc   :  { %v276_v60 = vadd.f32 %v692_v58, %v79_v47  ;;  %v270_v61 = vpop.f32.mrb[3].mxu0  ;;  %v361_v58 = vld [vmem:[%s1045_s3 + $0x30] sm:$0xff] }
  0xdd   :  { %v271_v62 = vadd.f32 %v270_v61, %v74_v45  ;;  %v774_v63 = vpack.c.bf16 %v340_v55, %v339_v57  ;;  %v134_v45 = vpop.permute.xlu0 %133  ;;  %v358_v55 = vld [vmem:[%s1045_s3 + $0x18] sm:$0xff]  ;;  %v360_v57 = vld [vmem:[%s1045_s3 + $0x28] sm:$0xff]  ;;  %v827_v61 = vmov 0.0  }
  0xde   :  { %v342_v0 = vmax.f32 %v276_v60, 0.0  ;;  %v825_v60 = vmov 0.0|0.0   ;;  %771 = vmatprep.mubr.msk.f32.mxu0 %vm826_vm2, %v827_v61 }
  0xdf   :  { %v341_v1 = vmax.f32 %v271_v62, 0.0  ;;  %v695_v2 = vpop.f32.mrb[4].mxu0  ;;  %775 = vmatprep.subr.bf16.mxu1 %v774_v63  ;;  %806 = vmatprep.subr.bf16.mxu0 %v825_v60  ;;  %v379_v62 = vpop.permute.xlu1 %378 }
  0xe0   :  { %v286_v3 = vadd.f32 %v695_v2, %v89_v49  ;;  %v280_v4 = vpop.f32.mrb[5].mxu0  ;;  %777 = vmatpush3.bf16.msra.mxu1 %v774_v63 }
  0xe1   :  { %v778_v6 = vpack.c.bf16 %v342_v0, %v341_v1  ;;  %v281_v7 = vadd.f32 %v280_v4, %v84_v50  ;;  %v374_v63 = vpop.permute.xlu0 %373 }
  0xe2   :  { %v344_v9 = vmax.f32 %v286_v3, 0.0 }
  0xe3   :  { %v343_v10 = vmax.f32 %v281_v7, 0.0  ;;  %v698_v11 = vpop.f32.mrb[6].mxu0  ;;  %779 = vmatprep.subr.bf16.mxu1 %v778_v6  ;;  %v389_v0 = vpop.permute.xlu1 %388 }
  0xe4   :  { %v296_v12 = vadd.f32 %v698_v11, %v99_v56  ;;  %v290_v13 = vpop.f32.mrb[7].mxu0  ;;  %781 = vmatpush3.bf16.msra.mxu1 %v778_v6  ;;  %v359_v56 = vld [vmem:[%s1045_s3 + $0x20] sm:$0xff] }
  0xe5   :  { %v782_v14 = vpack.c.bf16 %v344_v9, %v343_v10  ;;  %v291_v15 = vadd.f32 %v290_v13, %v94_v59  ;;  %v362_v59 = vld [vmem:[%s1045_s3 + $0x38] sm:$0xff]  ;;  %v384_v2 = vpop.permute.xlu0 %383 }
  0xe6   :  { %v346_v16 = vmax.f32 %v296_v12, 0.0 }
  0xe7   :  { %v345_v18 = vmax.f32 %v291_v15, 0.0  ;;  %v701_v19 = vpop.f32.mrb[8].mxu0  ;;  %783 = vmatprep.subr.bf16.mxu1 %v782_v14  ;;  %v399_v11 = vpop.permute.xlu1 %398 }
  0xe8   :  { %v306_v21 = vadd.f32 %v701_v19, %v109_v5  ;;  %v300_v22 = vpop.f32.mrb[9].mxu0  ;;  %785 = vmatpush3.bf16.msra.mxu1 %v782_v14 }
  0xe9   :  { %v786_v23 = vpack.c.bf16 %v346_v16, %v345_v18  ;;  %v301_v24 = vadd.f32 %v300_v22, %v104_v8  ;;  %v394_v14 = vpop.permute.xlu0 %393 }
  0xea   :  { %v348_v25 = vmax.f32 %v306_v21, 0.0 }
  0xeb   :  { %v347_v26 = vmax.f32 %v301_v24, 0.0  ;;  %v704_v27 = vpop.f32.mrb[10].mxu0  ;;  %787 = vmatprep.subr.bf16.mxu1 %v786_v23 }
  0xec   :  { %v316_v28 = vadd.f32 %v704_v27, %v119_v17  ;;  %v310_v29 = vpop.f32.mrb[11].mxu0  ;;  %789 = vmatpush3.bf16.msra.mxu1 %v786_v23  ;;  %v409_v23 = vpop.permute.xlu1 %408 }
  0xed   :  { %v790_v31 = vpack.c.bf16 %v348_v25, %v347_v26  ;;  %v311_v32 = vadd.f32 %v310_v29, %v114_v20  ;;  %v404_v26 = vpop.permute.xlu0 %403 }
  0xee   :  { %v350_v34 = vmax.f32 %v316_v28, 0.0 }
  0xef   :  { %v349_v35 = vmax.f32 %v311_v32, 0.0  ;;  %v707_v36 = vpop.f32.mrb[12].mxu0  ;;  %791 = vmatprep.subr.bf16.mxu1 %v790_v31 }
  0xf0   :  { %v326_v37 = vadd.f32 %v707_v36, %v129_v30  ;;  %v320_v38 = vpop.f32.mrb[13].mxu0  ;;  %793 = vmatpush3.bf16.msra.mxu1 %v790_v31 }
  0xf1   :  { %v794_v39 = vpack.c.bf16 %v350_v34, %v349_v35  ;;  %v321_v40 = vadd.f32 %v320_v38, %v124_v33  ;;  %v524_v34 = vld [vmem:[%s1046_s5] sm:$0x1]  ;;  %v531_v35 = vlaneseq  ;;  %v529_v38 = vpop.permute.xlu0 %528 }
  0xf2   :  { %v352_v41 = vmax.f32 %v326_v37, 0.0 }
  0xf3   :  { %v351_v43 = vmax.f32 %v321_v40, 0.0  ;;  %v710_v44 = vpop.f32.mrb[14].mxu0  ;;  %795 = vmatprep.subr.bf16.mxu1 %v794_v39  ;;  %v532_v36 = vshrl.u32 %v531_v35, 7 }
  0xf4   :  { %v336_v46 = vadd.f32 %v710_v44, %v139_v42  ;;  %v330_v47 = vpop.f32.mrb[15].mxu0  ;;  %797 = vmatpush3.bf16.msra.mxu1 %v794_v39 }
  0xf5   :  { %v798_v48 = vpack.c.bf16 %v352_v41, %v351_v43  ;;  %v331_v49 = vadd.f32 %v330_v47, %v134_v45  ;;  %v533_v37 = vsub.s32 0, %v532_v36 }
  0xf6   :  { %v354_v50 = vmax.f32 %v336_v46, 0.0 }
  0xf7   :  { %v353_v51 = vmax.f32 %v331_v49, 0.0  ;;  %799 = vmatprep.subr.bf16.mxu1 %v798_v48  ;;  %v534_v39 = vrot.slane %v529_v38, %v533_v37 }
  0xf8   :  { %801 = vmatpush3.bf16.msra.mxu1 %v798_v48 }
  0xf9   :  { %v802_v52 = vpack.c.bf16 %v354_v50, %v353_v51 }
  0xfb   :  { %803 = vmatprep.subr.bf16.mxu1 %v802_v52 }
  0xfc   :  { %805 = vmatpush3.bf16.msra.mxu1 %v802_v52 }
  0xff   :  { %744 = vmatmul.mubr.f32.vlgmr.msra.gmra.mrb[0].mxu1 %v356_v53 }
 0x100   :  { %746 = vmatprep.mubr.f32.mxu1 %v357_v54 }
 0x103   :  { %747 = vmatmul.mubr.f32.gmra.mrb[2].mxu1 %v358_v55 }
 0x104   :  { %749 = vmatprep.mubr.f32.mxu1 %v359_v56 }
 0x107   :  { %750 = vmatmul.mubr.f32.gmra.mrb[4].mxu1 %v360_v57 }
 0x108   :  { %752 = vmatprep.mubr.f32.mxu1 %v361_v58 }
 0x10b   :  { %753 = vmatmul.mubr.f32.gmra.mrb[6].mxu1 %v362_v59 }
 0x1d2   :  { %v745_v1 = vpop.f32.mrb[0].mxu1 }
 0x1d3   :  { %v483_v3 = vadd.f32 %v745_v1, %v379_v62  ;;  %v477_v4 = vpop.f32.mrb[1].mxu1 }
 0x1d4   :  { %v478_v5 = vadd.f32 %v477_v4, %v374_v63 }
 0x1d5   :  { %v517_v6 = vmax.f32 %v483_v3, 0.0 }
 0x1d6   :  { %v516_v7 = vmax.f32 %v478_v5, 0.0  ;;  %v748_v8 = vpop.f32.mrb[2].mxu1 }
 0x1d7   :  { %v493_v9 = vadd.f32 %v748_v8, %v389_v0  ;;  %v487_v10 = vpop.f32.mrb[3].mxu1 }
 0x1d8   :  { %v807_v12 = vpack.c.bf16 %v517_v6, %v516_v7  ;;  %v488_v13 = vadd.f32 %v487_v10, %v384_v2 }
 0x1d9   :  { %v519_v15 = vmax.f32 %v493_v9, 0.0 }
 0x1da   :  { %v518_v16 = vmax.f32 %v488_v13, 0.0  ;;  %v751_v17 = vpop.f32.mrb[4].mxu1  ;;  %808 = vmatpush3.bf16.msra.mxu0 %v807_v12 }
 0x1db   :  { %v503_v18 = vadd.f32 %v751_v17, %v399_v11  ;;  %v497_v19 = vpop.f32.mrb[5].mxu1  ;;  %809 = vmatprep.subr.bf16.mxu0 %v825_v60 }
 0x1dc   :  { %v810_v20 = vpack.c.bf16 %v519_v15, %v518_v16  ;;  %v498_v21 = vadd.f32 %v497_v19, %v394_v14 }
 0x1dd   :  { %v521_v22 = vmax.f32 %v503_v18, 0.0 }
 0x1de   :  { %v520_v24 = vmax.f32 %v498_v21, 0.0  ;;  %v754_v25 = vpop.f32.mrb[6].mxu1  ;;  %811 = vmatpush3.bf16.msra.mxu0 %v810_v20 }
 0x1df   :  { %v513_v27 = vadd.f32 %v754_v25, %v409_v23  ;;  %v507_v28 = vpop.f32.mrb[7].mxu1  ;;  %812 = vmatprep.subr.bf16.mxu0 %v825_v60 }
 0x1e0   :  { %v813_v29 = vpack.c.bf16 %v521_v22, %v520_v24  ;;  %v508_v30 = vadd.f32 %v507_v28, %v404_v26 }
 0x1e1   :  { %v523_v31 = vmax.f32 %v513_v27, 0.0 }
 0x1e2   :  { %v522_v32 = vmax.f32 %v508_v30, 0.0  ;;  %814 = vmatpush3.bf16.msra.mxu0 %v813_v29 }
 0x1e3   :  { %815 = vmatprep.subr.bf16.mxu0 %v825_v60 }
 0x1e4   :  { %v816_v33 = vpack.c.bf16 %v523_v31, %v522_v32 }
 0x1e6   :  { %817 = vmatpush3.bf16.msra.mxu0 %v816_v33 }
 0x1e9   :  { %772 = vmatmul.mubr.msk.f32.vlgmr.msra.gmra.mrb[16].mxu0 %vm535_vm3, %v524_v34 }
 0x2bc   :  { %v605_v40 = vpop.f32.mrb[16].mxu0 }
 0x2bd   :  { %v606_v41 = vadd.f32 %v605_v40, %v534_v39  ;;  %v773_v42 = vpop.f32.mrb[17].mxu0 }
 0x2bf   :  { %v634_v43 = vclamps-f32 %v606_v41, 2.0 }
 0x2c1   :  { %611 = vst [vmem:[%s1047_s7] sm:$0x1] %v634_v43 }

</bundles_post_ra>
